<compile_context>
chip_gen: v7x
topology: tpu7x:2x2x1
jax: 0.10.0
libtpu: 0.0.40
codegen_flags: <defaults>
</compile_context>

<pallas_src>
import jax
import jax.numpy as jnp
from jax.experimental import pallas as pl
from jax.experimental.pallas import tpu as pltpu

LEAKY_SLOPE = 0.2
LANE = 128
SUB_BF16 = 16   # bf16 sublane packing


def _round_up(x, m):
    return (x + m - 1) // m * m


# ----------------------------- Pallas kernel -------------------------------
def _conv_mm_leaky_kernel(w_ref, b_ref, p_ref, o_ref):
    # w_ref: [CP, Kdim] bf16 weight (zero-padded Cout->CP), grid-resident
    # b_ref: [CP, 1]    f32 bias (zero-padded), grid-resident
    # p_ref: [Kdim, TM] bf16 transposed im2col patch tile (M on lanes)
    # o_ref: [CP, TM]   f32 output tile (lane-dense stores, only CP=16 rows)
    acc = jnp.dot(w_ref[...], p_ref[...], preferred_element_type=jnp.float32)
    acc = acc + b_ref[...]                       # broadcast over lanes
    o_ref[...] = jnp.maximum(acc, LEAKY_SLOPE * acc)   # LeakyReLU, slope<1


def conv_leaky_pallas(w_p, bias_p, patches_t, *, tm):
    """w_p: [CP, Kdim] bf16, bias_p: [CP, 1] f32, patches_t: [Kdim, Mp] bf16."""
    CP, Kdim = w_p.shape
    _, Mp = patches_t.shape
    grid_m = pl.cdiv(Mp, tm)                     # partial last block allowed

    cost = pl.CostEstimate(
        flops=2 * CP * Kdim * Mp,
        transcendentals=0,
        bytes_accessed=(patches_t.size * patches_t.dtype.itemsize
                        + w_p.size * w_p.dtype.itemsize
                        + bias_p.size * 4
                        + CP * Mp * 4),
    )

    return pl.pallas_call(
        _conv_mm_leaky_kernel,
        out_shape=jax.ShapeDtypeStruct((CP, Mp), jnp.float32),
        grid_spec=pltpu.PrefetchScalarGridSpec(
            num_scalar_prefetch=0,
            grid=(grid_m,),
            in_specs=[
                pl.BlockSpec((CP, Kdim), lambda i: (0, 0)),   # weight, resident
                pl.BlockSpec((CP, 1), lambda i: (0, 0)),      # bias, resident
                pl.BlockSpec((Kdim, tm), lambda i: (0, i)),   # patch tile, pipelined
            ],
            out_specs=pl.BlockSpec((CP, tm), lambda i: (0, i)),
        ),
        compiler_params=pltpu.CompilerParams(
            dimension_semantics=("parallel",),                # megacore on v7x
            vmem_limit_bytes=32 * 1024 * 1024,
        ),
        cost_estimate=cost,
    )(w_p, bias_p, patches_t)


# ------------------------------- Wrapper ------------------------------------
def make_from_forward(x, weight, bias, *, stride=2, pad=1, tm=2048):
    """MakeFrom(s).forward(x) with s = Conv2d(k=4,s=2,p=1) + LeakyReLU(0.2).

    x:      [N, Cin, H, W]    (NCHW, float32)
    weight: [Cout, Cin, K, K] (PyTorch Conv2d layout)
    bias:   [Cout]
    returns [N, Cout, Ho, Wo] (NCHW, float32)
    """
    N, Cin, H, W = x.shape
    Cout, _, K, _ = weight.shape
    Ho = (H + 2 * pad - K) // stride + 1
    Wo = (W + 2 * pad - K) // stride + 1
    M = N * Ho * Wo
    Kdim = Cin * K * K

    # ---- im2col, built directly in the transposed [Kdim, M] bf16 layout ----
    # Row order (Cin, ky, kx) matches torch weight.reshape(Cout, -1); column
    # order is (n, ho, wo).  Cast to bf16 first so XLA fuses pad/slice/stack/
    # transpose into a single bf16 pass (half the wrapper HBM traffic).
    xb = x.astype(jnp.bfloat16)
    xp = jnp.pad(xb, ((0, 0), (0, 0), (pad, pad), (pad, pad)))
    cols = []
    for ky in range(K):
        for kx in range(K):
            cols.append(xp[:, :, ky:ky + Ho * stride:stride,
                               kx:kx + Wo * stride:stride])    # [N,Cin,Ho,Wo]
    cols = jnp.stack(cols, axis=2)                  # [N, Cin, K*K, Ho, Wo]
    patches_t = cols.transpose(1, 2, 0, 3, 4).reshape(Kdim, M)   # [Kdim, M]

    # ---- pad to lane/sublane-friendly shapes (minimal padding) ----
    Mp = _round_up(M, LANE)                         # M on lanes: pad to 128 only
    CP = _round_up(Cout, SUB_BF16)                  # 8 -> 16 (bf16 sublane pack)
    patches_t = jnp.pad(patches_t, ((0, 0), (0, Mp - M)))

    # tile size: lane-aligned, and keep >= 4 grid steps so both v7x
    # TensorCores get >= 2 pipelined steps each (no-op on v5e/v6e).
    tm = _round_up(max(LANE, min(tm, Mp)), LANE)
    tm_cap = _round_up(pl.cdiv(Mp, 4), LANE)
    tm = max(LANE, min(tm, tm_cap))

    w_p = weight.reshape(Cout, Kdim)                            # [Cout, Kdim]
    w_p = jnp.pad(w_p, ((0, CP - Cout), (0, 0))).astype(jnp.bfloat16)
    b_p = jnp.pad(bias.astype(jnp.float32), (0, CP - Cout)).reshape(CP, 1)

    out = conv_leaky_pallas(w_p, b_p, patches_t, tm=tm)         # [CP, Mp] f32
    out = out[:Cout, :M].reshape(Cout, N, Ho, Wo)               # drop zero-pad
    return out.transpose(1, 0, 2, 3)                            # NCHW


if __name__ == "__main__":
    key = jax.random.PRNGKey(0)
    k_x, k_w, k_b = jax.random.split(key, 3)

    # CIFAR10-sized spatial dims (32x32); Cin=4/Cout=8 as the representative
    # wrapped module.  M = 2*16*16 = 512 -> grid of 4 pipelined 128-lane tiles.
    N, Cin, H, W = 2, 4, 32, 32
    Cout, K = 8, 4

    x = jax.random.normal(k_x, (N, Cin, H, W), dtype=jnp.float32)
    # DCGAN-style init: N(0, 0.02) weights, small bias (deterministic)
    weight = 0.02 * jax.random.normal(k_w, (Cout, Cin, K, K), dtype=jnp.float32)
    bias = 0.01 * jax.random.normal(k_b, (Cout,), dtype=jnp.float32)

    y = make_from_forward(x, weight, bias)
    y = jax.block_until_ready(y)
    assert y.shape == (N, Cout, H // 2, W // 2), y.shape

    # numerical sanity check vs plain-XLA conv (bf16-input tolerance)
    ref = jax.lax.conv_general_dilated(
        x, weight, window_strides=(2, 2), padding=((1, 1), (1, 1)),
        dimension_numbers=("NCHW", "OIHW", "NCHW"))
    ref = ref + bias.reshape(1, Cout, 1, 1)
    ref = jnp.where(ref > 0, ref, LEAKY_SLOPE * ref)
    err = float(jnp.max(jnp.abs(y - ref)))
    assert err < 5e-2, err

    print("KERNEL_OK")
</pallas_src>

<mosaic_0001>
module attributes {stable_mosaic.version = 11 : i64} {
  func.func @_conv_mm_leaky_kernel(%arg0: i32, %arg1: memref<16x64xbf16, #tpu.memory_space<vmem>>, %arg2: memref<16x1xf32, #tpu.memory_space<vmem>>, %arg3: memref<64x128xbf16, #tpu.memory_space<vmem>>, %arg4: memref<16x128xf32, #tpu.memory_space<vmem>>) attributes {dimension_semantics = [#tpu.dimension_semantics<parallel>], iteration_bounds = array<i64: 4>, scalar_prefetch = 0 : i64, scratch_operands = 0 : i64, tpu.core_type = #tpu.core_type<tc>, window_params = [{pipeline_mode = #tpu.pipeline_mode<synchronous>, transform_indices = @transform_0, window_bounds = array<i64: 16, 64>}, {pipeline_mode = #tpu.pipeline_mode<synchronous>, transform_indices = @transform_1, window_bounds = array<i64: 16, 1>}, {transform_indices = @transform_2, window_bounds = array<i64: 64, 128>}, {transform_indices = @transform_3, window_bounds = array<i64: 16, 128>}]} {
    %c0 = arith.constant 0 : index
    %c0_0 = arith.constant 0 : index
    %0 = vector.load %arg1[%c0, %c0_0] : memref<16x64xbf16, #tpu.memory_space<vmem>>, vector<16x64xbf16>
    %c0_1 = arith.constant 0 : index
    %c0_2 = arith.constant 0 : index
    %1 = vector.load %arg3[%c0_1, %c0_2] : memref<64x128xbf16, #tpu.memory_space<vmem>>, vector<64x128xbf16>
    %cst = arith.constant dense<0.000000e+00> : vector<16x128xf32>
    %2 = tpu.matmul %0, %1, %cst {dimension_numbers = #tpu.dot_dimension_numbers<[1], [0], [0], [1], [0, 0, 1, 1], [], []>} : vector<16x64xbf16>, vector<64x128xbf16>, vector<16x128xf32> -> vector<16x128xf32>
    %c0_3 = arith.constant 0 : index
    %c0_4 = arith.constant 0 : index
    %3 = vector.load %arg2[%c0_3, %c0_4] : memref<16x1xf32, #tpu.memory_space<vmem>>, vector<16x1xf32>
    %4 = vector.broadcast %3 : vector<16x1xf32> to vector<16x128xf32>
    %5 = arith.addf %2, %4 : vector<16x128xf32>
    %cst_5 = arith.constant 2.000000e-01 : f32
    %6 = vector.broadcast %cst_5 : f32 to vector<16x128xf32>
    %7 = arith.mulf %6, %5 : vector<16x128xf32>
    %8 = arith.maximumf %5, %7 : vector<16x128xf32>
    %c0_6 = arith.constant 0 : index
    %c0_7 = arith.constant 0 : index
    %9 = vector.load %arg4[%c0_6, %c0_7] : memref<16x128xf32, #tpu.memory_space<vmem>>, vector<16x128xf32>
    tpu.vector_store %arg4[%c0_6, %c0_7], %8 {strides = array<i32>} : memref<16x128xf32, #tpu.memory_space<vmem>>, vector<16x128xf32>,
    return
  }
  func.func @transform_0(%arg0: i32) -> (i32, i32) {
    %c0_i32 = arith.constant 0 : i32
    %c0_i32_0 = arith.constant 0 : i32
    %c0_i32_1 = arith.constant 0 : i32
    return %c0_i32, %c0_i32_0 : i32, i32
  }
  func.func @transform_1(%arg0: i32) -> (i32, i32) {
    %c0_i32 = arith.constant 0 : i32
    %c0_i32_0 = arith.constant 0 : i32
    %c0_i32_1 = arith.constant 0 : i32
    return %c0_i32, %c0_i32_0 : i32, i32
  }
  func.func @transform_2(%arg0: i32) -> (i32, i32) {
    %c0_i32 = arith.constant 0 : i32
    %c0_i32_0 = arith.constant 0 : i32
    return %c0_i32, %arg0 : i32, i32
  }
  func.func @transform_3(%arg0: i32) -> (i32, i32) {
    %c0_i32 = arith.constant 0 : i32
    %c0_i32_0 = arith.constant 0 : i32
    return %c0_i32, %arg0 : i32, i32
  }
}

</mosaic_0001>

<bundles_post_ra>
// kernel: tpu_custom_call.1
= control target key start
LH: loop header
LB: loop body
LE: loop exit
PB: predicated region body
PF: predicated region fallthrough
CT: control target
= control target key end

     0   :  { %8 = vsyncpa [#allocation3], 0  ;;  %s774_s0 = inlined_call_operand.vmem [shape: bf16[16,64], index: 0, kind: input, shape index: {}]   ;;  %s775_s1 = inlined_call_operand.vmem [shape: f32[16,1], index: 1, kind: input, shape index: {}]   ;;  %s776_s2 = inlined_call_operand.hbm [shape: bf16[64,512], index: 2, kind: input, shape index: {}]   ;;  %s777_s3 = inlined_call_operand.hbm [shape: f32[16,512], index: 3, kind: output, shape index: {}]  }
   0x1   :  { %10 = vsyncpa [#allocation3 + $0x1], 0 }
   0x2   :  { %11 = vsyncpa [#allocation4], 0 }
   0x3   :  { %13 = vsyncpa [#allocation4 + $0x1], 0  ;;  %s602_s12 = smov 0   ;;  %s604_s13 = smov 0  }
   0x4   :  { %s606_s14 = smov 0   ;;  %s608_s15 = smov 0  }
   0x5 LB: > { %s623_s16 = sadd.s32 4294967295, %s569_s15   ;;  %s377_s17 = sadd.s32 4294967294, %s569_s15   ;;  %s569_s15 = sphi %s608_s15, %s790_s15   ;;  %s565_s14 = sphi %s606_s14, %s789_s14   ;;  %s561_s13 = sphi %s604_s13, %s788_s13   ;;  %s557_s12 = sphi %s602_s12, %s787_s12  }
   0x6   : > { %s627_s18 = sadd.s32 1, %s569_s15   ;;  %s68_s19 = sadd.s32 1, %s565_s14 }
   0x7   : > { %s65_s20 = ssub.s32 %s569_s15, %s627_s18  ;;  %p75_p0 = scmp.ne.s32.totalorder %s565_s14, %s561_s13 }
   0x8   : > { %p66_p1 = scmp.eq.s32.totalorder %s65_s20, 0  ;;  %p76_p2 = scmp.eq.s32.totalorder %s569_s15, 0 }
   0x9   : > { %p81_p3 = scmp.ne.s32.totalorder %s561_s13, %s557_s12  ;;  %p82_p4 = scmp.eq.s32.totalorder %s623_s16, 0 }
   0xa   : > { %s639_s21 = scalar_select %p66_p1, %s565_s14, %s68_s19  }
   0xb   : > { %p641_p5 = por %p76_p2, %p75_p0  ;;  %p645_p6 = por %p82_p4, %p81_p3 }
   0xc   : > { %p105_p7 = scmp.eq.s32.totalorder %s623_s16, 3  ;;  %p111_p8 = scmp.eq.s32.totalorder %s377_s17, 3 }
   0xd   : > { %p424_p9 = scmp.lt.s32.totalorder %s569_s15, 4  ;;  %s137_s26 = sand.u32 1, %s565_s14  }
   0xe   : > { %p651_p10 = por %p105_p7, %p75_p0  ;;  %p655_p11 = por %p111_p8, %p81_p3 }
   0xf   : > { %s381_s27 = sshll.u32 %s569_s15, 6  ;;  %s380_s28 = sshll.u32 %s137_s26, 5 }
  0x10   : > { %s781_s24 = scalar_select %p651_p10, 1, 0 }
  0x11   : > { %s782_s25 = scalar_select %p655_p11, 1, 0 }
  0x12   : > { %s664_s4 = scalar_lea.hbm %s776_s2, %s381_s27  ;;  %s141_s5 = scalar_lea.vmem [#allocation2], %s380_s28 }
  0x13   : > { %s147_s6 = sshll.u32 %s141_s5, 4  ;;  %p668_p12 = pnand %p424_p9, %p641_p5  ;;  %s672_s6 = int_to_ptr.vmem [resolvable:$true] %s147_s6 }
  0x14   : > { %s675_s8 = scalar_lea.sflag [#allocation3], %s137_s26  ;;  %s473_s9 = scalar_lea.hbm %s664_s4, 512 }
  0x15   : > { %p474_p0 = scmp.ne.s32.totalorder %s664_s4, %s473_s9  ;;  %p475_p1 = pneg %p668_p12 }
  0x16   : > { %s478_s17 = scalar_lea.hbm %s776_s2, 2048  ;;  %p479_p4 = scmp.lt.u32.totalorder %s664_s4, %s776_s2 }
  0x17   : > { %p476_p2 = pnand %p475_p1, %p474_p0  ;;  %p480_p5 = scmp.lt.u32.totalorder %s478_s17, %s473_s9 }
  0x18   : > { %p482_p8 = scmp.lt.u32.totalorder %s473_s9, %s664_s4 }
  0x19   : > { %p477_p3 = pneg %p476_p2  ;;  %p481_p7 = por %p480_p5, %p479_p4 }
  0x1b   : > { %p483_p9 = por %p482_p8, %p481_p7 }
  0x1d   : > { %p484_p13 = pnand %p483_p9, %p477_p3 }
  0x1f   : > { %487 = shalt.err (!%p484_p13)
}
  0x20   : > { %s488_s22 = scalar_lea.vmem %s672_s6, 512  ;;  %s571_s26 = smov [#allocation2]  }
  0x21   : > { %p489_p0 = scmp.ne.s32.totalorder %s672_s6, %s488_s22  ;;  %s493_s27 = sshll.u32 %s571_s26, 4  ;;  %s494_s27 = int_to_ptr.vmem [resolvable:$false] %s493_s27 }
  0x22   : > { %s495_s28 = scalar_lea.vmem %s494_s27, 1024  ;;  %p496_p10 = scmp.lt.s32.totalorder %s672_s6, %s494_s27 }
  0x23   : > { %p491_p2 = pnand %p489_p0, %p475_p1  ;;  %p497_p4 = scmp.lt.s32.totalorder %s495_s28, %s488_s22 }
  0x25   : > { %p492_p11 = pneg %p491_p2  ;;  %p498_p5 = por %p497_p4, %p496_p10 }
  0x27   : > { %p499_p7 = pnand %p498_p5, %p492_p11 }
  0x29   : > { %502 = shalt.err (!%p499_p7)
}
  0x2a   : > { %s572_s29 = smov 256   ;;  %s573_s30 = smov 64  }
  0x2b   : > { %s574_s5 = smov 4   ;;  %p155_p13 = scmp.lt.s32.totalorder %s569_s15, 5 }
  0x2c   : > { %419 = dma.hbm_to_vmem [thread:$0]  (!%p668_p12), %s664_s4, 512, %s672_s6, %s675_s8, %s572_s29, %s573_s30, %s574_s5  }
  0x2d   : > { %p784_p1 = scmp.ge.s32.totalorder %s569_s15, 1 }
  0x2f   : > { %p156_p3 = pnand %p784_p1, %p155_p13 }
  0x30   : > { %s707_s9 = sand.u32 (!%p156_p3), 1, %s561_s13  }
  0x31   : > { %159 = sbr.rel (%p156_p3) target bundleno = 310 (0x136), region = 32  ;;  %s383_s10 = sshll.u32 (!%p156_p3), %s707_s9, 5 }
  0x32   : > { %s162_s11 = scalar_lea.sflag (!%p156_p3), [#allocation3], %s707_s9  ;;  %s165_s17 = scalar_lea.vmem (!%p156_p3), [#allocation2], %s383_s10 }
  0x38   : > { %548 = dma.done.wait (%p645_p6), %s162_s11, 512  }
  0x39   : > { %550 = vsyncadd (%p645_p6), %s162_s11, 4294966784  ;;  %v575_v0 = vmov 0.0   ;;  %vm576_vm0 = vmmov 0   ;;  %v577_v1 = vmov 0   ;;  %v468_v2 = vld [vmem:[%s165_s17] sm:$0xff]   ;;  %v469_v3 = vld [vmem:[%s165_s17 + $0x8] sm:$0xff]  }
  0x3a   : > { %400 = vmatprep.subr.bf16.mxu0 %v575_v0  ;;  %408 = vmatprep.mubr.msk.bf16.mxu0 %vm576_vm0, %v575_v0  ;;  %v199_v4 = vld [vmem:[%s775_s1] sm:$0xff]  ;;  %v470_v5 = vld [vmem:[%s165_s17 + $0x10] sm:$0xff]   ;;  %v200_v6 = vld [vmem:[%s775_s1 + $0x8] sm:$0xff]  ;;  %vm240_vm1 = vcmask 523264   ;;  %s384_s20 = sshll.u32 %s707_s9, 4  ;;  %s392_s27 = sshll.u32 %s623_s16, 7 }
  0x3b   : > { %467 = vset.pattern.permute.xlu0 %v577_v1  ;;  %401 = vmatpush3.bf16.msra.mxu0 %v468_v2  ;;  %v471_v7 = vld [vmem:[%s165_s17 + $0x18] sm:$0xff]   ;;  %v472_v8 = vld [vmem:[%s774_s0] sm:$0xff]   ;;  %s187_s22 = scalar_lea.vmem [#allocation5], %s384_s20  ;;  %s731_s30 = scalar_lea.hbm %s777_s3, %s392_s27 }
  0x3c   : > { %402 = vmatprep.subr.bf16.mxu0 %v575_v0  ;;  %203 = vperm.xlu0 %467, %v199_v4   ;;  %s304_s26 = sshll.u32 %s187_s22, 4  ;;  %s292_s5 = scalar_lea.sflag [#allocation4], %s707_s9  ;;  %s726_s26 = int_to_ptr.vmem [resolvable:$true] %s304_s26 }
  0x3d   : > { %s503_s10 = scalar_lea.vmem %s726_s26, 256  ;;  %p785_p10 = scmp.ne.s32.totalorder %s781_s24, 0 }
  0x3e   : > { %p504_p6 = scmp.ne.s32.totalorder %s726_s26, %s503_s10  ;;  %s578_s16 = smov [#allocation5]  }
  0x3f   : > { %403 = vmatpush3.bf16.msra.mxu0 %v469_v3  ;;  %s507_s11 = sshll.u32 %s578_s16, 4  ;;  %s508_s11 = int_to_ptr.vmem [resolvable:$false] %s507_s11 }
  0x40   : > { %404 = vmatprep.subr.bf16.mxu0 %v575_v0  ;;  %208 = vperm.xlu0 %467, %v200_v6   ;;  %p505_p11 = pnand %p504_p6, %p785_p10  ;;  %s509_s17 = scalar_lea.vmem %s508_s11, 512 }
  0x41   : > { %p510_p8 = scmp.lt.s32.totalorder %s726_s26, %s508_s11  ;;  %p511_p9 = scmp.lt.s32.totalorder %s509_s17, %s503_s10 }
  0x42   : > { %p506_p12 = pneg %p505_p11 }
  0x43   : > { %405 = vmatpush3.bf16.msra.mxu0 %v470_v5  ;;  %p512_p0 = por %p511_p9, %p510_p8 }
  0x44   : > { %406 = vmatprep.subr.bf16.mxu0 %v575_v0 }
  0x45   : > { %p513_p2 = pnand %p512_p0, %p506_p12 }
  0x47   : > { %407 = vmatpush3.bf16.msra.mxu0 %v471_v7 }
  0x4a   : > { %409 = vmatmul.mubr.msk.bf16.vlgmr.msra.gmra.mrb[0].mxu0 %vm240_vm1, %v472_v8 }
  0xbb   : > { %v204_v9 = vpop.permute.xlu0 %203 }
  0xbf   : > { %v209_v13 = vpop.permute.xlu0 %208 }
 0x11d   : > { %v278_v10 = vpop.f32.mrb[0].mxu0 }
 0x11e   : > { %v279_v11 = vadd.f32 %v278_v10, %v204_v9  ;;  %v410_v12 = vpop.f32.mrb[1].mxu0 }
 0x11f   : > { %v281_v14 = vpop.f32.mrb[2].mxu0 }
 0x120   : > { %v285_v15 = vmul.f32 0.2, %v279_v11  ;;  %v282_v16 = vadd.f32 %v281_v14, %v209_v13  ;;  %v411_v17 = vpop.f32.mrb[3].mxu0 }
 0x122   : > { %v287_v18 = vmax.f32 %v279_v11, %v285_v15  ;;  %v286_v19 = vmul.f32 0.2, %v282_v16 }
 0x124   : > { %289 = vst [vmem:[%s187_s22] sm:$0xff] %v287_v18  ;;  %v288_v20 = vmax.f32 %v282_v16, %v286_v19 }
 0x126   : > { %290 = vst [vmem:[%s187_s22 + $0x8] sm:$0xff] %v288_v20 }
 0x127   : > { %516 = shalt.err (!%p513_p2)
}
 0x128   : > { %s517_s4 = scalar_lea.hbm %s731_s30, 256  ;;  %s521_s7 = scalar_lea.hbm %s777_s3, 1024 }
 0x129   : > { %p518_p4 = scmp.ne.s32.totalorder %s731_s30, %s517_s4  ;;  %p522_p13 = scmp.lt.u32.totalorder %s731_s30, %s777_s3 }
 0x12a   : > { %p523_p1 = scmp.lt.u32.totalorder %s521_s7, %s517_s4  ;;  %p525_p6 = scmp.lt.u32.totalorder %s517_s4, %s731_s30 }
 0x12b   : > { %p519_p5 = pnand %p518_p4, %p785_p10 }
 0x12c   : > { %p524_p3 = por %p523_p1, %p522_p13 }
 0x12d   : > { %p520_p7 = pneg %p519_p5 }
 0x12e   : > { %p526_p11 = por %p525_p6, %p524_p3 }
 0x130   : > { %p527_p12 = pnand %p526_p11, %p520_p7 }
 0x132   : > { %530 = shalt.err (!%p527_p12)
}
 0x133   : > { %s579_s20 = smov 128   ;;  %s580_s22 = smov 512  }
 0x134   : > { %s581_s27 = smov 8  }
 0x135   : > { %414 = dma.vmem_to_hbm [thread:$0]  (%p785_p10), %s726_s26, 256, %s731_s30, %s292_s5, %s579_s20, %s580_s22, %s581_s27  }
 0x136 PF: > { %p425_p8 = scmp.ge.s32.totalorder %s569_s15, 2  ;;  %s319_s28 = sand.u32 1, %s557_s12  }
 0x137   : > { %p786_p9 = scmp.ne.s32.totalorder %s782_s25, 0  ;;  %s320_s29 = scalar_lea.sflag [#allocation4], %s319_s28 }
 0x139   : > { %p421_p0 = pnand %p425_p8, %p786_p9 }
 0x13b   : > { %552 = dma.done.wait (!%p421_p0), %s320_s29, 256  }
 0x13c   : > { %554 = vsyncadd (!%p421_p0), %s320_s29, 4294967040  ;;  %p16_p2 = scmp.ge.s32.totalorder %s627_s18, 6   ;;  %s787_s12 = smov %s561_s13 }
 0x13d   : > { %s788_s13 = smov %s565_s14  ;;  %s789_s14 = smov %s639_s21 }
 0x13e   : > { %s790_s15 = smov %s627_s18  ;;  %18 = sbr.rel (!%p16_p2) target bundleno = 5 (0x5), region = 77 }
 0x145   :  { %325 = vsyncpa [#allocation3], 1 }
 0x146   :  { %327 = vsyncpa [#allocation3 + $0x1], 1 }
 0x147   :  { %328 = vsyncpa [#allocation4], 1 }
 0x148   :  { %330 = vsyncpa [#allocation4 + $0x1], 1 }

</bundles_post_ra>
